<compile_context>
chip_gen: v7x
topology: tpu7x:2x2x1
jax: 0.10.0
libtpu: 0.0.40
codegen_flags: <defaults>
</compile_context>

<pallas_src>
import jax
import jax.numpy as jnp
from jax.experimental import pallas as pl
from jax.experimental.pallas import tpu as pltpu


def se_gate_matmul_kernel(xse_ref, w1_ref, b1_ref, w2_ref, xmain_ref, o_ref):
    # conv2d41 (1x1, Cse->Cmid, bias) on the squeezed [1, Cse] input + sigmoid.
    # Tiny and grid-invariant; recomputing per HW tile costs ~nothing.
    g = jnp.dot(xse_ref[...], w1_ref[...], preferred_element_type=jnp.float32)
    g = jax.nn.sigmoid(g + b1_ref[...])                          # [1, Cmid] f32
    # Fold the gate into the small weight instead of the large activation.
    w2g = (w2_ref[...].astype(jnp.float32) * g).astype(jnp.bfloat16)  # [Cout, Cmid]
    # conv2d42 (1x1, Cmid->Cout, no bias) on this HW tile: [Cout,Cmid]@[Cmid,tile].
    o_ref[...] = jnp.dot(w2g, xmain_ref[...],
                         preferred_element_type=jnp.float32).astype(o_ref.dtype)


def se_block(x_se_nchw, x_main_nchw, w1, b1, w2, *, lane_tile=128):
    """x_se_nchw: [1, Cse, 1, 1], x_main_nchw: [1, Cmid, H, W]
       w1: [Cmid, Cse] (torch conv2d41 weight squeezed), b1: [Cmid]
       w2: [Cout, Cmid] (torch conv2d42 weight squeezed)
       returns: [1, Cout, H, W] float32"""
    _, cse, _, _ = x_se_nchw.shape
    _, cmid, H, W = x_main_nchw.shape
    cout = w2.shape[0]
    hw = H * W
    hw_pad = lane_tile * pl.cdiv(hw, lane_tile)
    grid_steps = hw_pad // lane_tile

    # Small gate operands stay f32.
    x_se = x_se_nchw.reshape(1, cse).astype(jnp.float32)             # [1, Cse]
    w1_t = jnp.transpose(w1).astype(jnp.float32)                     # [Cse, Cmid] (tiny)
    b1_r = b1.reshape(1, cmid).astype(jnp.float32)                   # [1, Cmid]
    # Large matmul operands in bf16 (in a full model these casts fuse upstream).
    w2_b = w2.astype(jnp.bfloat16)                                   # [Cout, Cmid]
    x_main = x_main_nchw.reshape(cmid, hw)                           # native layout, no .T
    x_main = jnp.pad(x_main, ((0, 0), (0, hw_pad - hw))).astype(jnp.bfloat16)

    bytes_accessed = (x_main.size * 2 + w2_b.size * 2 + w1_t.size * 4
                      + b1_r.size * 4 + x_se.size * 4 + cout * hw_pad * 4)

    out_pad = pl.pallas_call(
        se_gate_matmul_kernel,
        out_shape=jax.ShapeDtypeStruct((cout, hw_pad), jnp.float32),
        grid_spec=pltpu.PrefetchScalarGridSpec(
            num_scalar_prefetch=0,
            grid=(grid_steps,),
            in_specs=[
                pl.BlockSpec((1, cse), lambda i: (0, 0)),            # x_se
                pl.BlockSpec((cse, cmid), lambda i: (0, 0)),         # w1^T
                pl.BlockSpec((1, cmid), lambda i: (0, 0)),           # b1
                pl.BlockSpec((cout, cmid), lambda i: (0, 0)),        # w2
                pl.BlockSpec((cmid, lane_tile), lambda i: (0, i)),   # x_main tile
            ],
            out_specs=pl.BlockSpec((cout, lane_tile), lambda i: (0, i)),
        ),
        compiler_params=pltpu.CompilerParams(
            dimension_semantics=("parallel",),
        ),
        cost_estimate=pl.CostEstimate(
            flops=2 * cout * cmid * hw_pad + grid_steps * (2 * cse * cmid + cout * cmid),
            transcendentals=grid_steps * cmid,
            bytes_accessed=bytes_accessed,
        ),
    )(x_se, w1_t, b1_r, w2_b, x_main)

    # [Cout, HW_pad] -> drop pad -> [1, Cout, H, W]; no transpose needed.
    return out_pad[:, :hw].reshape(1, cout, H, W)


def reference(x_se_nchw, x_main_nchw, w1, b1, w2):
    cse = x_se_nchw.shape[1]
    g = jnp.dot(w1, x_se_nchw.reshape(cse)) + b1                     # [Cmid]
    g = jax.nn.sigmoid(g)
    gated = x_main_nchw * g.reshape(1, -1, 1, 1)                     # [1,Cmid,H,W]
    return jnp.einsum("oc,nchw->nohw", w2, gated)


if __name__ == "__main__":
    # Small shapes consistent with the module's structure
    # (original: Cse=48, Cmid=768, Cout=192, H=W=14 -> HW=196 pads to 256, grid=(2,)).
    Cse, Cmid, Cout, H, W = 16, 128, 64, 14, 14

    key = jax.random.PRNGKey(0)
    k1, k2, k3, k4, k5 = jax.random.split(key, 5)

    x_se = jax.random.normal(k1, (1, Cse, 1, 1), dtype=jnp.float32)      # x140
    x_main = jax.random.normal(k2, (1, Cmid, H, W), dtype=jnp.float32)   # x137
    # deterministic parameter init (synthetic, not a checkpoint)
    w1 = jax.random.normal(k3, (Cmid, Cse), dtype=jnp.float32) * 0.1     # conv2d41 weight
    b1 = jax.random.normal(k4, (Cmid,), dtype=jnp.float32) * 0.1         # conv2d41 bias
    w2 = jax.random.normal(k5, (Cout, Cmid), dtype=jnp.float32) * 0.05   # conv2d42 weight

    out = se_block(x_se, x_main, w1, b1, w2)
    out = jax.block_until_ready(out)

    ref = reference(x_se, x_main, w1, b1, w2)
    assert out.shape == (1, Cout, H, W)
    # bf16 operands in the big matmul -> compare against f32 reference with a
    # tolerance comfortably above bf16 accumulation error at these sizes.
    assert jnp.allclose(out, ref, atol=2e-2, rtol=2e-2)

    print("KERNEL_OK")
</pallas_src>

<mosaic_0001>
module attributes {stable_mosaic.version = 11 : i64} {
  func.func @se_gate_matmul_kernel(%arg0: i32, %arg1: memref<1x16xf32, #tpu.memory_space<vmem>>, %arg2: memref<16x128xf32, #tpu.memory_space<vmem>>, %arg3: memref<1x128xf32, #tpu.memory_space<vmem>>, %arg4: memref<64x128xbf16, #tpu.memory_space<vmem>>, %arg5: memref<128x128xbf16, #tpu.memory_space<vmem>>, %arg6: memref<64x128xf32, #tpu.memory_space<vmem>>) attributes {dimension_semantics = [#tpu.dimension_semantics<parallel>], iteration_bounds = array<i64: 2>, scalar_prefetch = 0 : i64, scratch_operands = 0 : i64, tpu.core_type = #tpu.core_type<tc>, window_params = [{pipeline_mode = #tpu.pipeline_mode<synchronous>, transform_indices = @transform_0, window_bounds = array<i64: 1, 16>}, {pipeline_mode = #tpu.pipeline_mode<synchronous>, transform_indices = @transform_1, window_bounds = array<i64: 16, 128>}, {pipeline_mode = #tpu.pipeline_mode<synchronous>, transform_indices = @transform_2, window_bounds = array<i64: 1, 128>}, {pipeline_mode = #tpu.pipeline_mode<synchronous>, transform_indices = @transform_3, window_bounds = array<i64: 64, 128>}, {transform_indices = @transform_4, window_bounds = array<i64: 128, 128>}, {transform_indices = @transform_5, window_bounds = array<i64: 64, 128>}]} {
    %c0 = arith.constant 0 : index
    %c0_0 = arith.constant 0 : index
    %0 = vector.load %arg1[%c0, %c0_0] : memref<1x16xf32, #tpu.memory_space<vmem>>, vector<1x16xf32>
    %c0_1 = arith.constant 0 : index
    %c0_2 = arith.constant 0 : index
    %1 = vector.load %arg2[%c0_1, %c0_2] : memref<16x128xf32, #tpu.memory_space<vmem>>, vector<16x128xf32>
    %cst = arith.constant dense<0.000000e+00> : vector<1x128xf32>
    %2 = tpu.matmul %0, %1, %cst {dimension_numbers = #tpu.dot_dimension_numbers<[1], [0], [0], [1], [0, 0, 1, 1], [], []>} : vector<1x16xf32>, vector<16x128xf32>, vector<1x128xf32> -> vector<1x128xf32>
    %c0_3 = arith.constant 0 : index
    %c0_4 = arith.constant 0 : index
    %3 = vector.load %arg3[%c0_3, %c0_4] : memref<1x128xf32, #tpu.memory_space<vmem>>, vector<1x128xf32>
    %4 = arith.addf %2, %3 : vector<1x128xf32>
    %5 = arith.negf %4 : vector<1x128xf32>
    %6 = math.exp %5 : vector<1x128xf32>
    %cst_5 = arith.constant 1.000000e+00 : f32
    %7 = vector.broadcast %cst_5 : f32 to vector<1x128xf32>
    %8 = arith.addf %7, %6 : vector<1x128xf32>
    %9 = arith.divf %7, %8 : vector<1x128xf32>
    %c0_6 = arith.constant 0 : index
    %c0_7 = arith.constant 0 : index
    %10 = vector.load %arg4[%c0_6, %c0_7] : memref<64x128xbf16, #tpu.memory_space<vmem>>, vector<64x128xbf16>
    %11 = arith.extf %10 : vector<64x128xbf16> to vector<64x128xf32>
    %12 = vector.broadcast %9 : vector<1x128xf32> to vector<64x128xf32>
    %13 = arith.mulf %11, %12 : vector<64x128xf32>
    %14 = arith.truncf %13 : vector<64x128xf32> to vector<64x128xbf16>
    %c0_8 = arith.constant 0 : index
    %c0_9 = arith.constant 0 : index
    %15 = vector.load %arg5[%c0_8, %c0_9] : memref<128x128xbf16, #tpu.memory_space<vmem>>, vector<128x128xbf16>
    %cst_10 = arith.constant dense<0.000000e+00> : vector<64x128xf32>
    %16 = tpu.matmul %14, %15, %cst_10 {dimension_numbers = #tpu.dot_dimension_numbers<[1], [0], [0], [1], [0, 0, 1, 1], [], []>} : vector<64x128xbf16>, vector<128x128xbf16>, vector<64x128xf32> -> vector<64x128xf32>
    %c0_11 = arith.constant 0 : index
    %c0_12 = arith.constant 0 : index
    %17 = vector.load %arg6[%c0_11, %c0_12] : memref<64x128xf32, #tpu.memory_space<vmem>>, vector<64x128xf32>
    tpu.vector_store %arg6[%c0_11, %c0_12], %16 {strides = array<i32>} : memref<64x128xf32, #tpu.memory_space<vmem>>, vector<64x128xf32>,
    return
  }
  func.func @transform_0(%arg0: i32) -> (i32, i32) {
    %c0_i32 = arith.constant 0 : i32
    %c0_i32_0 = arith.constant 0 : i32
    %c0_i32_1 = arith.constant 0 : i32
    return %c0_i32, %c0_i32_0 : i32, i32
  }
  func.func @transform_1(%arg0: i32) -> (i32, i32) {
    %c0_i32 = arith.constant 0 : i32
    %c0_i32_0 = arith.constant 0 : i32
    %c0_i32_1 = arith.constant 0 : i32
    return %c0_i32, %c0_i32_0 : i32, i32
  }
  func.func @transform_2(%arg0: i32) -> (i32, i32) {
    %c0_i32 = arith.constant 0 : i32
    %c0_i32_0 = arith.constant 0 : i32
    %c0_i32_1 = arith.constant 0 : i32
    return %c0_i32, %c0_i32_0 : i32, i32
  }
  func.func @transform_3(%arg0: i32) -> (i32, i32) {
    %c0_i32 = arith.constant 0 : i32
    %c0_i32_0 = arith.constant 0 : i32
    %c0_i32_1 = arith.constant 0 : i32
    return %c0_i32, %c0_i32_0 : i32, i32
  }
  func.func @transform_4(%arg0: i32) -> (i32, i32) {
    %c0_i32 = arith.constant 0 : i32
    %c0_i32_0 = arith.constant 0 : i32
    return %c0_i32, %arg0 : i32, i32
  }
  func.func @transform_5(%arg0: i32) -> (i32, i32) {
    %c0_i32 = arith.constant 0 : i32
    %c0_i32_0 = arith.constant 0 : i32
    return %c0_i32, %arg0 : i32, i32
  }
}

</mosaic_0001>

<bundles_post_ra>
// kernel: tpu_custom_call.1
= control target key start
LH: loop header
LB: loop body
LE: loop exit
PB: predicated region body
PF: predicated region fallthrough
CT: control target
= control target key end

     0   :  { %10 = vsyncpa [#allocation3], 0  ;;  %s1374_s0 = inlined_call_operand.hbm [shape: f32[1,16], index: 0, kind: input, shape index: {}]   ;;  %s1375_s1 = inlined_call_operand.hbm [shape: f32[16,128], index: 1, kind: input, shape index: {}]   ;;  %s1376_s2 = inlined_call_operand.vmem [shape: f32[1,128], index: 2, kind: input, shape index: {}]   ;;  %s1377_s3 = inlined_call_operand.hbm [shape: bf16[64,128], index: 3, kind: input, shape index: {}]   ;;  %s1378_s4 = inlined_call_operand.hbm [shape: bf16[128,256], index: 4, kind: input, shape index: {}]   ;;  %s1379_s5 = inlined_call_operand.hbm [shape: f32[64,256], index: 5, kind: output, shape index: {}]  }
   0x1   :  { %11 = vsyncpa [#allocation6], 0 }
   0x2   :  { %12 = vsyncpa [#allocation9], 0 }
   0x3   :  { %14 = vsyncpa [#allocation9 + $0x1], 0 }
   0x4   :  { %15 = vsyncpa [#allocation4], 0 }
   0x5   :  { %17 = vsyncpa [#allocation4 + $0x1], 0  ;;  %s1101_s18 = smov 0   ;;  %s1103_s19 = smov 0  }
   0x6   :  { %s1105_s20 = smov 0   ;;  %s1107_s21 = smov 0  }
   0x7 LB: > { %s1122_s22 = sadd.s32 4294967295, %s1054_s21   ;;  %s655_s23 = sadd.s32 4294967294, %s1054_s21   ;;  %s1054_s21 = sphi %s1107_s21, %s1412_s21   ;;  %s1050_s20 = sphi %s1105_s20, %s1411_s20   ;;  %s1046_s19 = sphi %s1103_s19, %s1410_s19   ;;  %s1042_s18 = sphi %s1101_s18, %s1409_s18  }
   0x8   : > { %s1126_s24 = sadd.s32 1, %s1054_s21   ;;  %s114_s25 = sadd.s32 1, %s1050_s20 }
   0x9   : > { %s111_s26 = ssub.s32 %s1054_s21, %s1126_s24  ;;  %p121_p0 = scmp.ne.s32.totalorder %s1050_s20, %s1046_s19 }
   0xa   : > { %p112_p1 = scmp.eq.s32.totalorder %s111_s26, 0  ;;  %p122_p2 = scmp.eq.s32.totalorder %s1054_s21, 0 }
   0xb   : > { %p127_p3 = scmp.ne.s32.totalorder %s1046_s19, %s1042_s18  ;;  %p1380_p4 = scmp.eq.s32.totalorder %s1122_s22, 0 }
   0xc   : > { %s1138_s27 = scalar_select %p112_p1, %s1050_s20, %s114_s25  }
   0xd   : > { %p1140_p5 = por %p122_p2, %p121_p0  ;;  %p1146_p6 = por %p1380_p4, %p127_p3 }
   0xe   : > { %1386 = sst [smem:[#allocation15_spill]] %s1138_s27  ;;  %p151_p7 = scmp.eq.s32.totalorder %s1122_s22, 1 }
   0xf   : > { %s1387_s28 = scalar_select %p1140_p5, 1, 0 }
  0x10   : > { %s1388_s29 = scalar_select %p1146_p6, 1, 0 }
  0x11   : > { %p157_p8 = scmp.eq.s32.totalorder %s655_s23, 1  ;;  %p656_p9 = scmp.ge.s32.totalorder %s1054_s21, 1 }
  0x12   : > { %p164_p10 = scmp.lt.s32.totalorder %s1054_s21, 3  ;;  %p1153_p11 = por %p151_p7, %p121_p0 }
  0x13   : > { %p1157_p12 = por %p157_p8, %p127_p3  ;;  %s1056_s8 = smov [#allocation5]  }
  0x14   : > { %s1389_s30 = scalar_select %p1153_p11, 1, 0 }
  0x15   : > { %s1390_s6 = scalar_select %p1157_p12, 1, 0 }
  0x16   : > { %p1161_p13 = pnand %p656_p9, %p164_p10  ;;  %s187_s9 = sshll.u32 %s1056_s8, 4  ;;  %s188_s9 = int_to_ptr.vmem [resolvable:$true] %s187_s9 }
  0x17   : > { %s1057_s11 = smov [#allocation2]   ;;  %s866_s15 = scalar_lea.hbm %s1375_s1, 256 }
  0x18   : > { %s1391_s7 = scalar_select %p1161_p13, 1, 0 }
  0x19   : > { %p783_p1 = pneg %p1161_p13  ;;  %s177_s12 = sshll.u32 %s1057_s11, 4  ;;  %s178_s12 = int_to_ptr.vmem [resolvable:$true] %s177_s12 }
  0x1a   : > { %p867_p7 = scmp.ne.s32.totalorder %s1375_s1, %s866_s15 }
  0x1b   : > { %p1169_p2 = pnand %p783_p1, %p1380_p4  ;;  %p873_p1 = scmp.lt.u32.totalorder %s866_s15, %s1375_s1 }
  0x1d   : > { %p1183_p8 = pneg %p1169_p2 }
  0x1f   : > { %p869_p9 = pnand %p1183_p8, %p867_p7 }
  0x21   : > { %p870_p10 = pneg %p869_p9 }
  0x23   : > { %p875_p0 = pnand %p873_p1, %p870_p10 }
  0x25   : > { %878 = shalt.err (!%p875_p0)
}
  0x26   : > { %s879_s8 = scalar_lea.vmem %s188_s9, 256  ;;  %p887_p11 = scmp.lt.s32.totalorder %s188_s9, %s188_s9 }
  0x27   : > { %p880_p4 = scmp.ne.s32.totalorder %s188_s9, %s879_s8  ;;  %p888_p6 = scmp.lt.s32.totalorder %s879_s8, %s879_s8 }
  0x29   : > { %p882_p3 = pnand %p880_p4, %p1183_p8  ;;  %p889_p13 = por %p888_p6, %p887_p11 }
  0x2b   : > { %p883_p12 = pneg %p882_p3 }
  0x2d   : > { %p890_p5 = pnand %p889_p13, %p883_p12 }
  0x2f   : > { %893 = shalt.err (!%p890_p5)
}
  0x30   : > { %s1385_s11 = smov 128   ;;  %s1059_s13 = smov 8  }
  0x31   : > { %789 = dma.hbm_to_vmem [thread:$0]  (!%p1169_p2), %s1375_s1, 256, %s188_s9, [#allocation6], %s1385_s11, %s1385_s11, %s1059_s13  }
  0x32   : > { %p1394_p4 = scmp.ne.s32.totalorder %s1387_s28, 0  ;;  %p1395_p0 = scmp.lt.s32.totalorder %s1054_s21, 2 }
  0x33   : > { %s894_s26 = scalar_lea.hbm %s1374_s0, 16 }
  0x34   : > { %p1205_p3 = pnand %p1395_p0, %p1394_p4  ;;  %p895_p5 = scmp.ne.s32.totalorder %s1374_s0, %s894_s26 }
  0x35   : > { %p901_p12 = scmp.lt.u32.totalorder %s894_s26, %s1374_s0 }
  0x36   : > { %s1396_s16 = scalar_select %p1205_p3, 1, 0 }
  0x37   : > { %p897_p6 = pnand %p895_p5, %p1183_p8 }
  0x39   : > { %p898_p11 = pneg %p897_p6 }
  0x3b   : > { %p903_p13 = pnand %p901_p12, %p898_p11 }
  0x3d   : > { %906 = shalt.err (!%p903_p13)
}
  0x3e   : > { %s907_s28 = scalar_lea.vmem %s178_s12, 16  ;;  %s914_s13 = scalar_lea.vmem %s178_s12, 32 }
  0x3f   : > { %p908_p7 = scmp.ne.s32.totalorder %s178_s12, %s907_s28  ;;  %p915_p1 = scmp.lt.s32.totalorder %s178_s12, %s178_s12 }
  0x40   : > { %p916_p4 = scmp.lt.s32.totalorder %s914_s13, %s907_s28 }
  0x41   : > { %p910_p9 = pnand %p908_p7, %p1183_p8 }
  0x42   : > { %p917_p0 = por %p916_p4, %p915_p1 }
  0x43   : > { %p911_p10 = pneg %p910_p9 }
  0x45   : > { %p918_p3 = pnand %p917_p0, %p911_p10 }
  0x47   : > { %921 = shalt.err (!%p918_p3)
}
  0x48   : > { %786 = dma.hbm_to_vmem [thread:$0]  (!%p1169_p2), %s1374_s0, 16, %s178_s12, [#allocation3]  }
  0x49   : > { %s1060_s17 = smov [#allocation7]   ;;  %s922_s14 = scalar_lea.hbm %s1377_s3, 512 }
  0x4a   : > { %s203_s25 = sshll.u32 %s1060_s17, 4  ;;  %p923_p5 = scmp.ne.s32.totalorder %s1377_s3, %s922_s14  ;;  %s204_s25 = int_to_ptr.vmem [resolvable:$true] %s203_s25 }
  0x4b   : > { %p929_p11 = scmp.lt.u32.totalorder %s922_s14, %s1377_s3 }
  0x4c   : > { %p925_p3 = pnand %p923_p5, %p1183_p8 }
  0x4e   : > { %p926_p6 = pneg %p925_p3 }
  0x50   : > { %p931_p12 = pnand %p929_p11, %p926_p6 }
  0x52   : > { %934 = shalt.err (!%p931_p12)
}
  0x53   : > { %s935_s12 = scalar_lea.vmem %s204_s25, 512  ;;  %p943_p10 = scmp.lt.s32.totalorder %s204_s25, %s204_s25 }
  0x54   : > { %p936_p13 = scmp.ne.s32.totalorder %s204_s25, %s935_s12  ;;  %p944_p1 = scmp.lt.s32.totalorder %s935_s12, %s935_s12 }
  0x56   : > { %p938_p7 = pnand %p936_p13, %p1183_p8  ;;  %p945_p4 = por %p944_p1, %p943_p10 }
  0x58   : > { %p939_p9 = pneg %p938_p7 }
  0x5a   : > { %p946_p0 = pnand %p945_p4, %p939_p9 }
  0x5c   : > { %949 = shalt.err (!%p946_p0)
}
  0x5d   : > { %s1061_s11 = smov 64   ;;  %s1062_s27 = smov 4  }
  0x5e   : > { %792 = dma.hbm_to_vmem [thread:$0]  (!%p1169_p2), %s1377_s3, 512, %s204_s25, [#allocation6], %s1061_s11, %s1061_s11, %s1062_s27  }
  0x5f   : > { %s217_s17 = sand.u32 1, %s1050_s20   ;;  %s662_s26 = sshll.u32 %s1054_s21, 6 }
  0x60   : > { %s661_s8 = sshll.u32 %s217_s17, 6  ;;  %s1253_s28 = scalar_lea.hbm %s1378_s4, %s662_s26 }
  0x61   : > { %s221_s10 = scalar_lea.vmem [#allocation8], %s661_s8  ;;  %s1257_s12 = scalar_lea.sflag [#allocation9], %s217_s17 }
  0x62   : > { %s227_s13 = sshll.u32 %s221_s10, 4  ;;  %s950_s15 = scalar_lea.hbm %s1253_s28, 1024  ;;  %s1255_s13 = int_to_ptr.vmem [resolvable:$true] %s227_s13 }
  0x63   : > { %p951_p2 = scmp.ne.s32.totalorder %s1253_s28, %s950_s15  ;;  %p1397_p8 = scmp.ne.s32.totalorder %s1396_s16, 0 }
  0x64   : > { %s955_s26 = scalar_lea.hbm %s1378_s4, 2048  ;;  %p956_p11 = scmp.lt.u32.totalorder %s1253_s28, %s1378_s4 }
  0x65   : > { %p952_p5 = pneg %p1397_p8  ;;  %p957_p12 = scmp.lt.u32.totalorder %s955_s26, %s950_s15 }
  0x66   : > { %p959_p7 = scmp.lt.u32.totalorder %s950_s15, %s1253_s28 }
  0x67   : > { %p953_p3 = pnand %p952_p5, %p951_p2  ;;  %p958_p13 = por %p957_p12, %p956_p11 }
  0x69   : > { %p954_p6 = pneg %p953_p3  ;;  %p960_p9 = por %p959_p7, %p958_p13 }
  0x6b   : > { %p961_p10 = pnand %p960_p9, %p954_p6 }
  0x6d   : > { %964 = shalt.err (!%p961_p10)
}
  0x6e   : > { %s965_s17 = scalar_lea.vmem %s1255_s13, 1024  ;;  %s1063_s8 = smov [#allocation8]  }
  0x6f   : > { %p966_p1 = scmp.ne.s32.totalorder %s1255_s13, %s965_s17  ;;  %s970_s10 = sshll.u32 %s1063_s8, 4  ;;  %s971_s10 = int_to_ptr.vmem [resolvable:$false] %s970_s10 }
  0x70   : > { %s972_s25 = scalar_lea.vmem %s971_s10, 2048  ;;  %p973_p2 = scmp.lt.s32.totalorder %s1255_s13, %s971_s10 }
  0x71   : > { %p968_p4 = pnand %p966_p1, %p952_p5  ;;  %p974_p3 = scmp.lt.s32.totalorder %s972_s25, %s965_s17 }
  0x73   : > { %p969_p0 = pneg %p968_p4  ;;  %p975_p11 = por %p974_p3, %p973_p2 }
  0x75   : > { %p976_p12 = pnand %p975_p11, %p969_p0 }
  0x77   : > { %979 = shalt.err (!%p976_p12)
}
  0x78   : > { %s1398_s15 = smov 128   ;;  %p1399_p5 = scmp.ne.s32.totalorder %s1391_s7, 0 }
  0x79   : > { %796 = dma.hbm_to_vmem [thread:$0]  (!%p1397_p8), %s1253_s28, 1024, %s1255_s13, %s1257_s12, %s1398_s15, %s1061_s11, %s1062_s27  }
  0x7a   : > { %239 = sbr.rel (%p1399_p5) target bundleno = 621 (0x26d), region = 40  ;;  %p1400_p6 = scmp.eq.s32.totalorder (!%p1399_p5), %s1122_s22, 0 }
  0x81   : > { %1025 = dma.done.wait (%p1400_p6), [#allocation3], 16   ;;  %p1401_p13 = pmov %p1400_p6 }
  0x82   : > { %p1402_p7 = pmov %p1400_p6 }
  0x83   : > { %1027 = vsyncadd (%p1401_p13), [#allocation3], 4294967280 }
  0x84   : > { %1029 = dma.done.wait (%p1402_p7), [#allocation6], 768   ;;  %p1403_p9 = pmov %p1400_p6 }
  0x85   : > { %s1299_s16 = sand.u32 1, %s1046_s19   ;;  %p1404_p8 = scmp.ne.s32.totalorder %s1388_s29, 0 }
  0x86   : > { %1031 = vsyncadd (%p1403_p9), [#allocation6], 4294966528  ;;  %s667_s7 = sshll.u32 %s1299_s16, 6  ;;  %s254_s11 = scalar_lea.sflag [#allocation9], %s1299_s16 }
  0x87   : > { %s1305_s27 = scalar_lea.vmem [#allocation8], %s667_s7 }
  0x88   : > { %1033 = dma.done.wait (%p1404_p8), %s254_s11, 1024  }
  0x89   : > { %1035 = vsyncadd (%p1404_p8), %s254_s11, 4294966272  ;;  %v1064_v0 = vmov 0.0|0.0   ;;  %vm1065_vm0 = vmmov 0   ;;  %v1066_v1 = vmov 0.0   ;;  %v286_v2 = vld [vmem:[#allocation5] sm:$0xff]  ;;  %v287_v3 = vld [vmem:[#allocation5 + $0x8] sm:$0xff]  ;;  %v385_v21 = vlaneseq }
  0x8a   : > { %748 = vmatprep.subr.bf16.mxu0 %v1064_v0  ;;  %721 = vmatprep.mubr.msk.f32.mxu0 %vm1065_vm0, %v1066_v1  ;;  %vm289_vm1 = vcmask 130048   ;;  %v749_v4 = vpack.c.bf16 %v287_v3, %v286_v2  ;;  %v285_v5 = vld [vmem:[#allocation2] sm:$0x1]  ;;  %v854_v6 = vld [vmem:[%s1305_s27] sm:$0xff]   ;;  %v856_v8 = vld [vmem:[%s1305_s27 + $0x10] sm:$0xff]   ;;  %s283_s13 = scalar_lea.vmem [#allocation10], %s667_s7 }
  0x8b   : > { %751 = vmatprep.subr.bf16.mxu1 %v854_v6  ;;  %v855_v7 = vld [vmem:[%s1305_s27 + $0x8] sm:$0xff]   ;;  %v857_v9 = vld [vmem:[%s1305_s27 + $0x18] sm:$0xff]   ;;  %v858_v10 = vld [vmem:[%s1305_s27 + $0x20] sm:$0xff]   ;;  %v386_v22 = vshrl.u32 %v385_v21, 7  ;;  %s551_s12 = sshll.u32 %s283_s13, 4  ;;  %s680_s23 = sshll.u32 %s1122_s22, 7  ;;  %s1325_s12 = int_to_ptr.vmem [resolvable:$true] %s551_s12 }
  0x8c   : > { %750 = vmatpush3.bf16.msra.mxu0 %v749_v4  ;;  %759 = vmatpush3.bf16.msra.mxu1 %v854_v6  ;;  %v859_v11 = vld [vmem:[%s1305_s27 + $0x28] sm:$0xff]   ;;  %v860_v12 = vld [vmem:[%s1305_s27 + $0x30] sm:$0xff]   ;;  %v861_v13 = vld [vmem:[%s1305_s27 + $0x38] sm:$0xff]   ;;  %s1330_s9 = scalar_lea.hbm %s1379_s5, %s680_s23  ;;  %s539_s22 = scalar_lea.sflag [#allocation4], %s1299_s16 }
  0x8d   : > { %724 = vmatprep.subr.bf16.mxu0 %v854_v6  ;;  %752 = vmatprep.subr.bf16.mxu1 %v855_v7  ;;  %v288_v14 = vld [vmem:[%s1376_s2] sm:$0x1]  ;;  %v684_v23 = vld [vmem:[#allocation7] sm:$0xff]   ;;  %v700_v24 = vld [vmem:[#allocation7 + $0x10] sm:$0xff]   ;;  %v387_v25 = vsub.s32 0, %v386_v22  ;;  %s980_s17 = scalar_lea.vmem %s1325_s12, 1024 }
  0x8e   : > { %v699_v26 = vld [vmem:[#allocation7 + $0x8] sm:$0xff]   ;;  %v701_v27 = vld [vmem:[#allocation7 + $0x18] sm:$0xff]   ;;  %v685_v28 = vunpack.c.l.bf16 %v684_v23  ;;  %v686_v29 = vunpack.c.h.bf16 %v684_v23  ;;  %v693_v30 = vunpack.c.l.bf16 %v700_v24  ;;  %v694_v31 = vunpack.c.h.bf16 %v700_v24  ;;  %p981_p10 = scmp.ne.s32.totalorder %s1325_s12, %s980_s17  ;;  %p1405_p1 = scmp.ne.s32.totalorder %s1389_s30, 0 }
  0x8f   : > { %722 = vmatmul.mubr.msk.f32.vlgmr.msra.gmra.mrb[0].mxu0 %vm289_vm1, %v285_v5  ;;  %v689_v33 = vunpack.c.l.bf16 %v699_v26  ;;  %v690_v34 = vunpack.c.h.bf16 %v699_v26  ;;  %v697_v35 = vunpack.c.l.bf16 %v701_v27  ;;  %v698_v36 = vunpack.c.h.bf16 %v701_v27  ;;  %s1067_s8 = smov [#allocation10]  }
  0x90   : > { %725 = vmatpush3.bf16.msra.mxu0 %v854_v6  ;;  %760 = vmatpush3.bf16.msra.mxu1 %v855_v7  ;;  %p982_p4 = pnand %p981_p10, %p1405_p1  ;;  %s984_s10 = sshll.u32 %s1067_s8, 4  ;;  %s985_s10 = int_to_ptr.vmem [resolvable:$false] %s984_s10 }
  0x91   : > { %726 = vmatprep.subr.bf16.mxu0 %v855_v7  ;;  %753 = vmatprep.subr.bf16.mxu1 %v856_v8  ;;  %s986_s25 = scalar_lea.vmem %s985_s10, 2048  ;;  %p987_p2 = scmp.lt.s32.totalorder %s1325_s12, %s985_s10 }
  0x92   : > { %p983_p0 = pneg %p982_p4  ;;  %p988_p3 = scmp.lt.s32.totalorder %s986_s25, %s980_s17 }
  0x94   : > { %727 = vmatpush3.bf16.msra.mxu0 %v855_v7  ;;  %761 = vmatpush3.bf16.msra.mxu1 %v856_v8  ;;  %p989_p11 = por %p988_p3, %p987_p2 }
  0x95   : > { %728 = vmatprep.subr.bf16.mxu0 %v856_v8  ;;  %754 = vmatprep.subr.bf16.mxu1 %v857_v9 }
  0x96   : > { %p990_p12 = pnand %p989_p11, %p983_p0 }
  0x98   : > { %729 = vmatpush3.bf16.msra.mxu0 %v856_v8  ;;  %762 = vmatpush3.bf16.msra.mxu1 %v857_v9 }
  0x99   : > { %730 = vmatprep.subr.bf16.mxu0 %v857_v9  ;;  %755 = vmatprep.subr.bf16.mxu1 %v858_v10 }
  0x9c   : > { %731 = vmatpush3.bf16.msra.mxu0 %v857_v9  ;;  %763 = vmatpush3.bf16.msra.mxu1 %v858_v10 }
  0x9d   : > { %732 = vmatprep.subr.bf16.mxu0 %v858_v10  ;;  %756 = vmatprep.subr.bf16.mxu1 %v859_v11 }
  0xa0   : > { %733 = vmatpush3.bf16.msra.mxu0 %v858_v10  ;;  %764 = vmatpush3.bf16.msra.mxu1 %v859_v11 }
  0xa1   : > { %734 = vmatprep.subr.bf16.mxu0 %v859_v11  ;;  %757 = vmatprep.subr.bf16.mxu1 %v860_v12 }
  0xa4   : > { %735 = vmatpush3.bf16.msra.mxu0 %v859_v11  ;;  %765 = vmatpush3.bf16.msra.mxu1 %v860_v12 }
  0xa5   : > { %736 = vmatprep.subr.bf16.mxu0 %v860_v12  ;;  %758 = vmatprep.subr.bf16.mxu1 %v861_v13 }
  0xa8   : > { %737 = vmatpush3.bf16.msra.mxu0 %v860_v12  ;;  %766 = vmatpush3.bf16.msra.mxu1 %v861_v13 }
  0xa9   : > { %738 = vmatprep.subr.bf16.mxu0 %v861_v13 }
  0xac   : > { %739 = vmatpush3.bf16.msra.mxu0 %v861_v13 }
 0x162   : > { %v359_v15 = vpop.f32.mrb[0].mxu0 }
 0x163   : > { %v360_v16 = vadd.f32 %v359_v15, %v288_v14  ;;  %v723_v17 = vpop.f32.mrb[1].mxu0 }
 0x165   : > { %v670_v18 = vmul.f32 -1.442695, %v360_v16 }
 0x167   : > { %862 = vpow2.f32 %v670_v18 }
 0x171   : > { %v863_v19 = vpop.eup %862 }
 0x172   : > { %v366_v20 = vadd.f32 1.0, %v863_v19 }
 0x174   : > { %864 = vrcp.f32 %v366_v20 }
 0x17e   : > { %v865_v32 = vpop.eup %864 }
 0x17f   : > { %v388_v37 = vrot.slane %v865_v32, %v387_v25 }
 0x181   : > { %v389_v38 = vmul.f32 %v685_v28, %v388_v37  ;;  %v390_v39 = vmul.f32 %v686_v29, %v388_v37  ;;  %v393_v40 = vmul.f32 %v693_v30, %v388_v37  ;;  %v394_v41 = vmul.f32 %v694_v31, %v388_v37 }
 0x182   : > { %v391_v42 = vmul.f32 %v689_v33, %v388_v37  ;;  %v392_v43 = vmul.f32 %v690_v34, %v388_v37  ;;  %v395_v44 = vmul.f32 %v697_v35, %v388_v37  ;;  %v396_v45 = vmul.f32 %v698_v36, %v388_v37 }
 0x183   : > { %v397_v46 = vpack.c.bf16 %v390_v39, %v389_v38  ;;  %v399_v47 = vpack.c.bf16 %v394_v41, %v393_v40 }
 0x184   : > { %v398_v48 = vpack.c.bf16 %v392_v43, %v391_v42  ;;  %v400_v49 = vpack.c.bf16 %v396_v45, %v395_v44 }
 0x185   : > { %740 = vmatprep.mubr.bf16.mxu0 %v397_v46  ;;  %744 = vmatprep.mubr.bf16.mxu1 %v399_v47 }
 0x186   : > { %741 = vmatmul.mubr.bf16.vlgmr.msra.gmra.mrb[4].mxu0 %v398_v48  ;;  %745 = vmatmul.mubr.bf16.vlgmr.msra.gmra.mrb[0].mxu1 %v400_v49 }
 0x259   : > { %v742_v50 = vpop.f32.mrb[4].mxu0  ;;  %v746_v51 = vpop.f32.mrb[0].mxu1 }
 0x25a   : > { %532 = vst [vmem:[%s283_s13 + $0x10] sm:$0xff] %v742_v50  ;;  %536 = vst [vmem:[%s283_s13 + $0x30] sm:$0xff] %v746_v51  ;;  %v499_v52 = vpop.f32.mrb[5].mxu0  ;;  %v515_v53 = vpop.f32.mrb[1].mxu1 }
 0x25b   : > { %530 = vst [vmem:[%s283_s13] sm:$0xff] %v499_v52  ;;  %534 = vst [vmem:[%s283_s13 + $0x20] sm:$0xff] %v515_v53  ;;  %v743_v54 = vpop.f32.mrb[6].mxu0  ;;  %v747_v55 = vpop.f32.mrb[2].mxu1 }
 0x25c   : > { %533 = vst [vmem:[%s283_s13 + $0x18] sm:$0xff] %v743_v54  ;;  %537 = vst [vmem:[%s283_s13 + $0x38] sm:$0xff] %v747_v55  ;;  %v502_v56 = vpop.f32.mrb[7].mxu0  ;;  %v518_v57 = vpop.f32.mrb[3].mxu1 }
 0x25d   : > { %531 = vst [vmem:[%s283_s13 + $0x8] sm:$0xff] %v502_v56  ;;  %535 = vst [vmem:[%s283_s13 + $0x28] sm:$0xff] %v518_v57 }
 0x25e   : > { %993 = shalt.err (!%p990_p12)
}
 0x25f   : > { %s994_s15 = scalar_lea.hbm %s1330_s9, 1024  ;;  %s998_s27 = scalar_lea.hbm %s1379_s5, 2048 }
 0x260   : > { %p995_p5 = scmp.ne.s32.totalorder %s1330_s9, %s994_s15  ;;  %p999_p7 = scmp.lt.u32.totalorder %s1330_s9, %s1379_s5 }
 0x261   : > { %p1000_p9 = scmp.lt.u32.totalorder %s998_s27, %s994_s15  ;;  %p1002_p10 = scmp.lt.u32.totalorder %s994_s15, %s1330_s9 }
 0x262   : > { %p996_p6 = pnand %p995_p5, %p1405_p1 }
 0x263   : > { %p1001_p8 = por %p1000_p9, %p999_p7 }
 0x264   : > { %p997_p13 = pneg %p996_p6 }
 0x265   : > { %p1003_p4 = por %p1002_p10, %p1001_p8 }
 0x267   : > { %p1004_p0 = pnand %p1003_p4, %p997_p13 }
 0x269   : > { %1007 = shalt.err (!%p1004_p0)
}
 0x26a   : > { %s1068_s13 = smov 128   ;;  %s1069_s23 = smov 256  }
 0x26b   : > { %s1070_s26 = smov 8  }
 0x26c   : > { %781 = dma.vmem_to_hbm [thread:$0]  (%p1405_p1), %s1325_s12, 1024, %s1330_s9, %s539_s22, %s1068_s13, %s1069_s23, %s1070_s26  }
 0x26d PF: > { %s566_s14 = sand.u32 1, %s1042_s18   ;;  %p1406_p2 = scmp.ne.s32.totalorder %s1390_s6, 0 }
 0x26e   : > { %p1407_p3 = scmp.ge.s32.totalorder %s1054_s21, 2  ;;  %s567_s17 = scalar_lea.sflag [#allocation4], %s566_s14 }
 0x270   : > { %p798_p11 = pnand %p1407_p3, %p1406_p2 }
 0x272   : > { %1037 = dma.done.wait (!%p798_p11), %s567_s17, 1024  }
 0x273   : > { %1039 = vsyncadd (!%p798_p11), %s567_s17, 4294966272  ;;  %s1408_s8 = sld [smem:[#allocation15_spill]]  ;;  %p20_p12 = scmp.ge.s32.totalorder %s1126_s24, 4  }
 0x274   : > { %s1409_s18 = smov %s1046_s19  ;;  %s1410_s19 = smov %s1050_s20 }
 0x275   : > { %s1412_s21 = smov %s1126_s24  ;;  %22 = sbr.rel (!%p20_p12) target bundleno = 7 (0x7), region = 98 }
 0x279   : > { %s1411_s20 = smov %s1408_s8 }
 0x27c   :  { %572 = vsyncpa [#allocation3], 1 }
 0x27d   :  { %574 = vsyncpa [#allocation3 + $0x1], 1 }
 0x27e   :  { %575 = vsyncpa [#allocation6], 1 }
 0x27f   :  { %576 = vsyncpa [#allocation9], 1 }
 0x280   :  { %578 = vsyncpa [#allocation9 + $0x1], 1 }
 0x281   :  { %579 = vsyncpa [#allocation4], 1 }
 0x282   :  { %581 = vsyncpa [#allocation4 + $0x1], 1 }

</bundles_post_ra>
